<compile_context>
chip_gen: v6e
topology: v6e:2x2x1
jax: 0.10.0
libtpu: 0.0.40
codegen_flags: <defaults>
</compile_context>

<pallas_src>
import functools

import jax
import jax.numpy as jnp
from jax.experimental import pallas as pl
from jax.experimental.pallas import tpu as pltpu


def _round_up(a: int, b: int) -> int:
    return (a + b - 1) // b * b


# ---------------------------------------------------------------------------
# Kernel bodies
# ---------------------------------------------------------------------------
def _matmul_step(x_ref, w_ref, acc_ref):
    """One K-tile of the accumulated matmul (MXU, f32 accumulation)."""
    @pl.when(pl.program_id(1) == 0)
    def _():
        acc_ref[...] = jnp.zeros_like(acc_ref)

    acc_ref[...] += jnp.dot(
        x_ref[...], w_ref[...], preferred_element_type=jnp.float32
    )


def _linear_kernel(x_ref, w_ref, o_ref, acc_ref):
    """Logits only (targets=None path)."""
    _matmul_step(x_ref, w_ref, acc_ref)

    @pl.when(pl.program_id(1) == pl.num_programs(1) - 1)
    def _():
        o_ref[...] = acc_ref[...].astype(o_ref.dtype)


def _linear_ce_kernel(x_ref, w_ref, tgt_ref, o_ref, ce_ref, acc_ref, *, out_dim):
    """Logits + fused per-row cross-entropy epilogue."""
    _matmul_step(x_ref, w_ref, acc_ref)

    @pl.when(pl.program_id(1) == pl.num_programs(1) - 1)
    def _():
        logits = acc_ref[...]                              # (tm, C_pad) f32
        o_ref[...] = logits.astype(o_ref.dtype)

        tm, c_pad = logits.shape
        col_ids = jax.lax.broadcasted_iota(jnp.int32, (tm, c_pad), 1)
        # Exclude zero-padded classes from the log-sum-exp.
        masked = jnp.where(col_ids < out_dim, logits, jnp.float32(-1e30))
        m = jnp.max(masked, axis=-1, keepdims=True)
        lse = m + jnp.log(jnp.sum(jnp.exp(masked - m), axis=-1, keepdims=True))
        tgt = tgt_ref[...]                                 # (tm, 1) int32
        tgt_logit = jnp.sum(
            jnp.where(col_ids == tgt, logits, 0.0), axis=-1, keepdims=True
        )
        ce_ref[...] = lse - tgt_logit                      # (tm, 1) per-row CE


# ---------------------------------------------------------------------------
# LinearProbe forward (wrapper)
# ---------------------------------------------------------------------------
def linear_probe_forward(x, w_t, targets=None, *, tm=512, tk=1024):
    """x: (..., in_dim); w_t: (in_dim, out_dim); targets: optional int (N,)."""
    in_dim, out_dim = w_t.shape
    x2d = x.reshape(-1, in_dim).astype(jnp.float32)
    n = x2d.shape[0]

    # ---- pad to (8,128)-aligned, lane-dense tiles ----
    c_pad = _round_up(out_dim, 128)                 # lane-dense output columns
    tm = min(tm, _round_up(n, 8))
    n_pad = _round_up(n, tm)
    tk = min(tk, _round_up(in_dim, 128))
    k_pad = _round_up(in_dim, tk)

    x_pad = jnp.zeros((n_pad, k_pad), jnp.float32).at[:n, :in_dim].set(x2d)
    w_pad = (
        jnp.zeros((k_pad, c_pad), jnp.float32)
        .at[:in_dim, :out_dim]
        .set(w_t.astype(jnp.float32))
    )

    grid = (n_pad // tm, k_pad // tk)
    x_spec = pl.BlockSpec((tm, tk), lambda i, k: (i, k))
    w_spec = pl.BlockSpec((tk, c_pad), lambda i, k: (k, 0))
    o_spec = pl.BlockSpec((tm, c_pad), lambda i, k: (i, 0))
    scratch = [pltpu.VMEM((tm, c_pad), jnp.float32)]
    cparams = pltpu.CompilerParams(
        dimension_semantics=("parallel", "arbitrary"),
        vmem_limit_bytes=32 * 1024 * 1024,
    )
    flops = 2 * n_pad * k_pad * c_pad
    base_bytes = (n_pad * k_pad + k_pad * c_pad + n_pad * c_pad) * 4

    if targets is None:
        logits_pad = pl.pallas_call(
            _linear_kernel,
            out_shape=jax.ShapeDtypeStruct((n_pad, c_pad), jnp.float32),
            grid_spec=pltpu.PrefetchScalarGridSpec(
                num_scalar_prefetch=0,
                grid=grid,
                in_specs=[x_spec, w_spec],
                out_specs=o_spec,
                scratch_shapes=scratch,
            ),
            compiler_params=cparams,
            cost_estimate=pl.CostEstimate(
                flops=flops, transcendentals=0, bytes_accessed=base_bytes
            ),
        )(x_pad, w_pad)
        return logits_pad[:n, :out_dim], None

    assert n == targets.shape[0]
    tgt_pad = (
        jnp.zeros((n_pad, 1), jnp.int32).at[:n, 0].set(targets.astype(jnp.int32))
    )

    logits_pad, ce_rows = pl.pallas_call(
        functools.partial(_linear_ce_kernel, out_dim=out_dim),
        out_shape=(
            jax.ShapeDtypeStruct((n_pad, c_pad), jnp.float32),
            jax.ShapeDtypeStruct((n_pad, 1), jnp.float32),
        ),
        grid_spec=pltpu.PrefetchScalarGridSpec(
            num_scalar_prefetch=0,
            grid=grid,
            in_specs=[x_spec, w_spec, pl.BlockSpec((tm, 1), lambda i, k: (i, 0))],
            out_specs=(o_spec, pl.BlockSpec((tm, 1), lambda i, k: (i, 0))),
            scratch_shapes=scratch,
        ),
        compiler_params=cparams,
        cost_estimate=pl.CostEstimate(
            flops=flops,
            transcendentals=n_pad * c_pad,
            bytes_accessed=base_bytes + n_pad * 8,
        ),
    )(x_pad, w_pad, tgt_pad)

    logits = logits_pad[:n, :out_dim]
    loss = jnp.mean(ce_rows[:n, 0])   # mean over the TRUE N (padded rows sliced off)
    return logits, loss


# ---------------------------------------------------------------------------
# Demo / self-check
# ---------------------------------------------------------------------------
if __name__ == "__main__":
    key = jax.random.PRNGKey(0)
    k_x, k_w, k_t = jax.random.split(key, 3)

    # -------- small shapes matching the module (B=2, T=4, hidden=32, C=8) ----
    B, T = 2, 4
    in_dim, out_dim = 32, 8
    N = B * T

    x = jax.random.normal(k_x, (B, T, in_dim), dtype=jnp.float32)
    bound = 1.0 / (in_dim ** 0.5)
    w_torch_layout = jax.random.uniform(
        k_w, (out_dim, in_dim), minval=-bound, maxval=bound, dtype=jnp.float32
    )
    w_t = w_torch_layout.T                      # (in_dim, out_dim)
    targets = jax.random.randint(k_t, (N,), 0, out_dim, dtype=jnp.int32)

    logits, loss = linear_probe_forward(x, w_t, targets)
    logits = jax.block_until_ready(logits)
    loss = jax.block_until_ready(loss)

    ref_logits = x.reshape(-1, in_dim) @ w_t
    ref_lse = jax.nn.logsumexp(ref_logits, axis=-1)
    ref_loss = jnp.mean(ref_lse - ref_logits[jnp.arange(N), targets])
    assert jnp.allclose(logits, ref_logits, atol=1e-5, rtol=1e-5)
    assert jnp.allclose(loss, ref_loss, atol=1e-5, rtol=1e-5)

    # targets=None path (loss is None, matching the PyTorch module).
    logits_only, no_loss = linear_probe_forward(x, w_t, None)
    jax.block_until_ready(logits_only)
    assert no_loss is None
    assert jnp.allclose(logits_only, ref_logits, atol=1e-5, rtol=1e-5)

    # -------- exercise the multi-tile grid + padding path (still small) ------
    k_x2, k_w2, k_t2 = jax.random.split(jax.random.PRNGKey(1), 3)
    N2, in_dim2, out_dim2 = 15, 200, 5          # ragged: pads N->16, K->256
    x2 = jax.random.normal(k_x2, (N2, in_dim2), dtype=jnp.float32)
    w2 = jax.random.normal(k_w2, (in_dim2, out_dim2), dtype=jnp.float32) * 0.05
    t2 = jax.random.randint(k_t2, (N2,), 0, out_dim2, dtype=jnp.int32)
    lg2, ls2 = linear_probe_forward(x2, w2, t2, tm=8, tk=128)  # 2x2 grid
    lg2 = jax.block_until_ready(lg2)
    ls2 = jax.block_until_ready(ls2)
    ref2 = x2 @ w2
    ref2_loss = jnp.mean(
        jax.nn.logsumexp(ref2, axis=-1) - ref2[jnp.arange(N2), t2]
    )
    assert jnp.allclose(lg2, ref2, atol=1e-4, rtol=1e-4)
    assert jnp.allclose(ls2, ref2_loss, atol=1e-4, rtol=1e-4)

    print("KERNEL_OK")
</pallas_src>

<mosaic_0001>
module attributes {stable_mosaic.version = 11 : i64} {
  func.func @_linear_ce_kernel(%arg0: i32, %arg1: i32, %arg2: memref<8x128xf32, #tpu.memory_space<vmem>>, %arg3: memref<128x128xf32, #tpu.memory_space<vmem>>, %arg4: memref<8x1xi32, #tpu.memory_space<vmem>>, %arg5: memref<8x128xf32, #tpu.memory_space<vmem>>, %arg6: memref<8x1xf32, #tpu.memory_space<vmem>>, %arg7: memref<8x128xf32, #tpu.memory_space<vmem>>) attributes {dimension_semantics = [#tpu.dimension_semantics<parallel>, #tpu.dimension_semantics<arbitrary>], iteration_bounds = array<i64: 1, 1>, scalar_prefetch = 0 : i64, scratch_operands = 1 : i64, tpu.core_type = #tpu.core_type<tc>, window_params = [{transform_indices = @transform_0, window_bounds = array<i64: 8, 128>}, {transform_indices = @transform_1, window_bounds = array<i64: 128, 128>}, {transform_indices = @transform_2, window_bounds = array<i64: 8, 1>}, {transform_indices = @transform_3, window_bounds = array<i64: 8, 128>}, {transform_indices = @transform_4, window_bounds = array<i64: 8, 1>}]} {
    %c0_i32 = arith.constant 0 : i32
    %0 = arith.cmpi eq, %arg1, %c0_i32 : i32
    %1 = arith.extui %0 : i1 to i32
    %c0_i32_0 = arith.constant 0 : i32
    %2 = arith.cmpi ne, %1, %c0_i32_0 : i32
    scf.if %2 {
      %cst_10 = arith.constant 0.000000e+00 : f32
      %12 = vector.broadcast %cst_10 : f32 to vector<8x128xf32>
      %c0_11 = arith.constant 0 : index
      %c0_12 = arith.constant 0 : index
      %13 = vector.load %arg7[%c0_11, %c0_12] : memref<8x128xf32, #tpu.memory_space<vmem>>, vector<8x128xf32>
      tpu.vector_store %arg7[%c0_11, %c0_12], %12 {strides = array<i32>} : memref<8x128xf32, #tpu.memory_space<vmem>>, vector<8x128xf32>,
    } else {
    }
    %c0 = arith.constant 0 : index
    %c0_1 = arith.constant 0 : index
    %3 = vector.load %arg7[%c0, %c0_1] : memref<8x128xf32, #tpu.memory_space<vmem>>, vector<8x128xf32>
    %c0_2 = arith.constant 0 : index
    %c0_3 = arith.constant 0 : index
    %4 = vector.load %arg2[%c0_2, %c0_3] : memref<8x128xf32, #tpu.memory_space<vmem>>, vector<8x128xf32>
    %c0_4 = arith.constant 0 : index
    %c0_5 = arith.constant 0 : index
    %5 = vector.load %arg3[%c0_4, %c0_5] : memref<128x128xf32, #tpu.memory_space<vmem>>, vector<128x128xf32>
    %cst = arith.constant dense<0.000000e+00> : vector<8x128xf32>
    %6 = tpu.matmul %4, %5, %cst {dimension_numbers = #tpu.dot_dimension_numbers<[1], [0], [0], [1], [0, 0, 1, 1], [], []>} : vector<8x128xf32>, vector<128x128xf32>, vector<8x128xf32> -> vector<8x128xf32>
    %7 = arith.addf %3, %6 : vector<8x128xf32>
    %c0_6 = arith.constant 0 : index
    %c0_7 = arith.constant 0 : index
    %8 = vector.load %arg7[%c0_6, %c0_7] : memref<8x128xf32, #tpu.memory_space<vmem>>, vector<8x128xf32>
    tpu.vector_store %arg7[%c0_6, %c0_7], %7 {strides = array<i32>} : memref<8x128xf32, #tpu.memory_space<vmem>>, vector<8x128xf32>,
    %c0_i32_8 = arith.constant 0 : i32
    %9 = arith.cmpi eq, %arg1, %c0_i32_8 : i32
    %10 = arith.extui %9 : i1 to i32
    %c0_i32_9 = arith.constant 0 : i32
    %11 = arith.cmpi ne, %10, %c0_i32_9 : i32
    scf.if %11 {
      %c0_10 = arith.constant 0 : index
      %c0_11 = arith.constant 0 : index
      %12 = vector.load %arg7[%c0_10, %c0_11] : memref<8x128xf32, #tpu.memory_space<vmem>>, vector<8x128xf32>
      %c0_12 = arith.constant 0 : index
      %c0_13 = arith.constant 0 : index
      %13 = vector.load %arg5[%c0_12, %c0_13] : memref<8x128xf32, #tpu.memory_space<vmem>>, vector<8x128xf32>
      tpu.vector_store %arg5[%c0_12, %c0_13], %12 {strides = array<i32>} : memref<8x128xf32, #tpu.memory_space<vmem>>, vector<8x128xf32>,
      %14 = tpu.iota {dimensions = array<i32: 1>} : vector<8x128xi32>
      %c8_i32 = arith.constant 8 : i32
      %15 = vector.broadcast %c8_i32 : i32 to vector<8x128xi32>
      %16 = arith.cmpi slt, %14, %15 : vector<8x128xi32>
      %cst_14 = arith.constant -1.000000e+30 : f32
      %17 = vector.broadcast %cst_14 : f32 to vector<8x128xf32>
      %18 = arith.select %16, %12, %17 : vector<8x128xi1>, vector<8x128xf32>
      %cst_15 = arith.constant dense<0xFF800000> : vector<8xf32>
      %19 = vector.multi_reduction <maximumf>, %18, %cst_15 [1] : vector<8x128xf32> to vector<8xf32>
      %20 = vector.shape_cast %19 : vector<8xf32> to vector<8x1xf32>
      %21 = vector.broadcast %20 : vector<8x1xf32> to vector<8x128xf32>
      %22 = arith.subf %18, %21 : vector<8x128xf32>
      %23 = math.exp %22 : vector<8x128xf32>
      %cst_16 = arith.constant dense<0.000000e+00> : vector<8xf32>
      %24 = vector.multi_reduction <add>, %23, %cst_16 [1] : vector<8x128xf32> to vector<8xf32>
      %25 = vector.shape_cast %24 : vector<8xf32> to vector<8x1xf32>
      %26 = math.log %25 : vector<8x1xf32>
      %27 = arith.addf %20, %26 : vector<8x1xf32>
      %c0_17 = arith.constant 0 : index
      %c0_18 = arith.constant 0 : index
      %28 = vector.load %arg4[%c0_17, %c0_18] : memref<8x1xi32, #tpu.memory_space<vmem>>, vector<8x1xi32>
      %29 = vector.broadcast %28 : vector<8x1xi32> to vector<8x128xi32>
      %30 = arith.cmpi eq, %14, %29 : vector<8x128xi32>
      %cst_19 = arith.constant 0.000000e+00 : f32
      %31 = vector.broadcast %cst_19 : f32 to vector<8x128xf32>
      %32 = arith.select %30, %12, %31 : vector<8x128xi1>, vector<8x128xf32>
      %cst_20 = arith.constant dense<0.000000e+00> : vector<8xf32>
      %33 = vector.multi_reduction <add>, %32, %cst_20 [1] : vector<8x128xf32> to vector<8xf32>
      %34 = vector.shape_cast %33 : vector<8xf32> to vector<8x1xf32>
      %35 = arith.subf %27, %34 : vector<8x1xf32>
      %c0_21 = arith.constant 0 : index
      %c0_22 = arith.constant 0 : index
      %36 = vector.load %arg6[%c0_21, %c0_22] : memref<8x1xf32, #tpu.memory_space<vmem>>, vector<8x1xf32>
      tpu.vector_store %arg6[%c0_21, %c0_22], %35 {strides = array<i32>} : memref<8x1xf32, #tpu.memory_space<vmem>>, vector<8x1xf32>,
    } else {
    }
    return
  }
  func.func @transform_0(%arg0: i32, %arg1: i32) -> (i32, i32) {
    %c0_i32 = arith.constant 0 : i32
    return %arg0, %arg1 : i32, i32
  }
  func.func @transform_1(%arg0: i32, %arg1: i32) -> (i32, i32) {
    %c0_i32 = arith.constant 0 : i32
    %c0_i32_0 = arith.constant 0 : i32
    return %arg1, %c0_i32 : i32, i32
  }
  func.func @transform_2(%arg0: i32, %arg1: i32) -> (i32, i32) {
    %c0_i32 = arith.constant 0 : i32
    %c0_i32_0 = arith.constant 0 : i32
    return %arg0, %c0_i32 : i32, i32
  }
  func.func @transform_3(%arg0: i32, %arg1: i32) -> (i32, i32) {
    %c0_i32 = arith.constant 0 : i32
    %c0_i32_0 = arith.constant 0 : i32
    return %arg0, %c0_i32 : i32, i32
  }
  func.func @transform_4(%arg0: i32, %arg1: i32) -> (i32, i32) {
    %c0_i32 = arith.constant 0 : i32
    %c0_i32_0 = arith.constant 0 : i32
    return %arg0, %c0_i32 : i32, i32
  }
}

</mosaic_0001>

<bundles_post_ra>
// kernel: tpu_custom_call.1
= control target key start
LH: loop header
LB: loop body
LE: loop exit
PB: predicated region body
PF: predicated region fallthrough
CT: control target
= control target key end

     0   :  { %10 = vsyncpa [#allocation4], 0  ;;  %s330_s0 = inlined_call_operand.vmem [shape: f32[8,128], index: 0, kind: input, shape index: {}]   ;;  %s331_s1 = inlined_call_operand.hbm [shape: f32[128,128], index: 1, kind: input, shape index: {}]   ;;  %s332_s2 = inlined_call_operand.vmem [shape: s32[8,1], index: 2, kind: input, shape index: {}]   ;;  %s333_s3 = inlined_call_operand.hbm [shape: f32[8,128], index: 3, kind: output, shape index: {0}]   ;;  %s334_s4 = inlined_call_operand.vmem [shape: f32[8,1], index: 4, kind: output, shape index: {1}]  }
   0x1   :  { %11 = vsyncpa [#allocation5], 0  ;;  %s283_s15 = smov [#allocation3]  }
   0x2   :  { %s19_s16 = sshll.u32 %s283_s15, 4  ;;  %s20_s16 = int_to_ptr.vmem [resolvable:$true] %s19_s16 }
   0x3   :  { %s247_s17 = scalar_lea.vmem %s20_s16, 2048  ;;  %p252_p1 = scmp.lt.s32.totalorder %s20_s16, %s20_s16 }
   0x4   :  { %p248_p0 = scmp.ne.s32.totalorder %s20_s16, %s247_s17  ;;  %p253_p2 = scmp.lt.s32.totalorder %s247_s17, %s247_s17 }
   0x6   :  { %p254_p3 = por %p253_p2, %p252_p1 }
   0x8   :  { %p255_p4 = pnand %p254_p3, %p248_p0 }
   0xa   :  { %258 = shalt.err (!%p255_p4)
}
   0xb   :  { %s284_s18 = smov 128   ;;  %s285_s19 = smov 8  }
   0xc   :  { %25 = dma.hbm_to_vmem [thread:$0]  %s331_s1, 2048, %s20_s16, [#allocation4], %s284_s18, %s284_s18, %s285_s19  }
   0xd   :  { %279 = dma.done.wait [#allocation4], 2048  }
   0xe   :  { %280 = vsyncadd [#allocation4], 4294965248  ;;  %v286_v0 = vmov 0.0   ;;  %vm287_vm0 = vmmov 0   ;;  %v53_v1 = vld [vmem:[#allocation3 + $0x78] sm:$0xff]  ;;  %v52_v2 = vld [vmem:[#allocation3 + $0x70] sm:$0xff]  ;;  %v131_v19 = vlaneseq }
   0xf   :  { %192 = vmatprep.subr.mxu0 %v286_v0  ;;  %224 = vmatprep.mubr.msk.f32.mxu0 %vm287_vm0, %v286_v0  ;;  %v51_v3 = vld [vmem:[#allocation3 + $0x68] sm:$0xff]  ;;  %v50_v4 = vld [vmem:[#allocation3 + $0x60] sm:$0xff]  ;;  %v49_v5 = vld [vmem:[#allocation3 + $0x58] sm:$0xff]  ;;  %v288_v18 = vmov 0  }
  0x10   :  { %193 = vmatpush3.msra.mxu0 %v53_v1  ;;  %v48_v6 = vld [vmem:[#allocation3 + $0x50] sm:$0xff]  ;;  %v47_v7 = vld [vmem:[#allocation3 + $0x48] sm:$0xff]  ;;  %v46_v8 = vld [vmem:[#allocation3 + $0x40] sm:$0xff]  ;;  %234 = vset.pattern.permute.xlu0 %v288_v18  ;;  %v132_v20 = vand.u32 127, %v131_v19 }
  0x11   :  { %194 = vmatprep.subr.mxu0 %v286_v0  ;;  %v45_v9 = vld [vmem:[#allocation3 + $0x38] sm:$0xff]  ;;  %v44_v10 = vld [vmem:[#allocation3 + $0x30] sm:$0xff]  ;;  %v43_v11 = vld [vmem:[#allocation3 + $0x28] sm:$0xff] }
  0x12   :  { %195 = vmatpush3.msra.mxu0 %v52_v2  ;;  %v42_v12 = vld [vmem:[#allocation3 + $0x20] sm:$0xff]  ;;  %v41_v13 = vld [vmem:[#allocation3 + $0x18] sm:$0xff]  ;;  %v40_v14 = vld [vmem:[#allocation3 + $0x10] sm:$0xff]  ;;  %vm133_vm1 = vcmp.lt.s32.totalorder %v132_v20, 8 }
  0x13   :  { %196 = vmatprep.subr.mxu0 %v286_v0  ;;  %v39_v15 = vld [vmem:[#allocation3 + $0x8] sm:$0xff]  ;;  %v38_v16 = vld [vmem:[#allocation3] sm:$0xff] }
  0x14   :  { %197 = vmatpush3.msra.mxu0 %v51_v3  ;;  %v37_v17 = vld [vmem:[%s330_s0] sm:$0xff]  ;;  %s289_s0 = smov [#allocation6]  }
  0x15   :  { %198 = vmatprep.subr.mxu0 %v286_v0  ;;  %v145_v24 = vld [vmem:[%s332_s2] sm:$0xff]  ;;  %s162_s25 = sshll.u32 %s289_s0, 4  ;;  %s163_s25 = int_to_ptr.vmem [resolvable:$true] %s162_s25 }
  0x16   :  { %199 = vmatpush3.msra.mxu0 %v50_v4  ;;  %s259_s26 = scalar_lea.vmem %s163_s25, 128  ;;  %p264_p6 = scmp.lt.s32.totalorder %s163_s25, %s163_s25 }
  0x17   :  { %200 = vmatprep.subr.mxu0 %v286_v0  ;;  %p260_p5 = scmp.ne.s32.totalorder %s163_s25, %s259_s26  ;;  %p265_p7 = scmp.lt.s32.totalorder %s259_s26, %s259_s26 }
  0x18   :  { %201 = vmatpush3.msra.mxu0 %v49_v5 }
  0x19   :  { %202 = vmatprep.subr.mxu0 %v286_v0  ;;  %p266_p8 = por %p265_p7, %p264_p6 }
  0x1a   :  { %203 = vmatpush3.msra.mxu0 %v48_v6 }
  0x1b   :  { %204 = vmatprep.subr.mxu0 %v286_v0  ;;  %p267_p9 = pnand %p266_p8, %p260_p5 }
  0x1c   :  { %205 = vmatpush3.msra.mxu0 %v47_v7 }
  0x1d   :  { %206 = vmatprep.subr.mxu0 %v286_v0 }
  0x1e   :  { %207 = vmatpush3.msra.mxu0 %v46_v8 }
  0x1f   :  { %208 = vmatprep.subr.mxu0 %v286_v0 }
  0x20   :  { %209 = vmatpush3.msra.mxu0 %v45_v9 }
  0x21   :  { %210 = vmatprep.subr.mxu0 %v286_v0 }
  0x22   :  { %211 = vmatpush3.msra.mxu0 %v44_v10 }
  0x23   :  { %212 = vmatprep.subr.mxu0 %v286_v0 }
  0x24   :  { %213 = vmatpush3.msra.mxu0 %v43_v11 }
  0x25   :  { %214 = vmatprep.subr.mxu0 %v286_v0 }
  0x26   :  { %215 = vmatpush3.msra.mxu0 %v42_v12 }
  0x27   :  { %216 = vmatprep.subr.mxu0 %v286_v0 }
  0x28   :  { %217 = vmatpush3.msra.mxu0 %v41_v13 }
  0x29   :  { %218 = vmatprep.subr.mxu0 %v286_v0 }
  0x2a   :  { %219 = vmatpush3.msra.mxu0 %v40_v14 }
  0x2b   :  { %220 = vmatprep.subr.mxu0 %v286_v0 }
  0x2c   :  { %221 = vmatpush3.msra.mxu0 %v39_v15 }
  0x2d   :  { %222 = vmatprep.subr.mxu0 %v286_v0 }
  0x2e   :  { %223 = vmatpush3.msra.mxu0 %v38_v16 }
  0x2f   :  { %225 = vmatmul.mubr.f32.vlgmr.msra.gmra.mxu0 %v37_v17 }
  0xef   :  { %v120_v21 = vpop.f32.mrf.mxu0 }
  0xf0   :  { %130 = vst [vmem:[#allocation6] sm:$0xff] %v120_v21  ;;  %v134_v22 = vsel %vm133_vm1, %v120_v21, -1e+30 }
  0xf1   :  { %135 = vmax.xlane.f32.xlu0 %v134_v22  ;;  %v226_v23 = vpop.f32.mrf.mxu0 }
 0x107   :  { %147 = vperm.xlu0 %234, %v145_v24  }
 0x17a   :  { %v136_v25 = vpop.xlane.xlu0 %135 }
 0x17b   :  { %v137_v26 = vsub.f32 %v134_v22, %v136_v25 }
 0x17d   :  { %v138_v27 = vmul.f32 1.442695, %v137_v26 }
 0x17f   :  { %235 = vpow2.f32 %v138_v27 }
 0x182   :  { %v148_v28 = vpop.permute.xlu0 %147 }
 0x183   :  { %vm149_vm2 = vcmp.eq.s32.totalorder %v132_v20, %v148_v28 }
 0x184   :  { %v150_v30 = vsel %vm149_vm2, %v120_v21, 0.0 }
 0x18c   :  { %v236_v29 = vpop.eup %235 }
 0x18d   :  { %140 = vadd.xlane.f32.xlu1 %v236_v29 }
 0x191   :  { %151 = vadd.xlane.f32.xlu1 %v150_v30 }
 0x192   :  { %270 = shalt.err (!%p267_p9)
}
 0x193   :  { %165 = dma.vmem_to_hbm [thread:$0]  %s163_s25, 128, %s333_s3, [#allocation5]   ;;  %vm154_vm3 = vcmask 7168  }
 0x216   :  { %v141_v31 = vpop.xlane.xlu1 %140 }
 0x217   :  { %237 = vlog2.f32 %v141_v31 }
 0x21a   :  { %v152_v35 = vpop.xlane.xlu1 %151 }
 0x224   :  { %v238_v32 = vpop.eup %237 }
 0x225   :  { %v143_v33 = vmul.f32 0.6931472, %v238_v32 }
 0x227   :  { %v144_v34 = vadd.f32 %v143_v33, %v136_v25 }
 0x229   :  { %v153_v36 = vsub.f32 %v144_v34, %v152_v35 }
 0x22b   :  { %155 = vst.msk [vmem:[%s334_s4] sm:$0xff] %vm154_vm3, %v153_v36 }
 0x22c   :  { %281 = dma.done.wait [#allocation5], 128  }
 0x22d   :  { %282 = vsyncadd [#allocation5], 4294967168 }
 0x22e   :  { %173 = vsyncpa [#allocation4], 1 }
 0x22f   :  { %174 = vsyncpa [#allocation5], 1 }

</bundles_post_ra>
